<compile_context>
chip_gen: v6e
topology: v6e:2x2x1
jax: 0.10.0
libtpu: 0.0.40
codegen_flags: <defaults>
</compile_context>

<pallas_src>
import functools

import jax
import jax.numpy as jnp
from jax import lax
from jax.experimental import pallas as pl
from jax.experimental.pallas import tpu as pltpu

_LANE = 128
_SUBLANE = 8
_TILE_BYTE_BUDGET = 8 * 1024 * 1024   # per x-tile buffer (Pallas double-buffers it)
_MAX_BLOCK_M = 32768


def _round_up(v, m):
    return ((v + m - 1) // m) * m


def _pick_tiles(n, f, itemsize):
    """Return (tm, tk); tk is None for the single-F-block path."""
    f_pad = _round_up(f, _LANE)                 # lane padding of the x tile in VMEM
    row_bytes = f_pad * itemsize
    if _LANE * row_bytes <= _TILE_BYTE_BUDGET:
        # Whole feature dim in one block; only the byte budget binds tm.
        tm = (_TILE_BYTE_BUDGET // row_bytes // _LANE) * _LANE
        tm = max(_LANE, min(_MAX_BLOCK_M, tm))
        # Keep >= 4 batch tiles when the input is big so v7x's two TCs each get
        # >= 2 pipelined steps (harmless on single-TC v5e/v6e).
        if n * row_bytes >= (2 << 20):
            tm = min(tm, max(_LANE, (n // (4 * _LANE)) * _LANE))
        if n <= tm:
            tm = n
        return tm, None
    # Very large F: split the reduction axis; accumulate into VMEM scratch.
    tm = 512 if n >= 512 else n
    tk = (_TILE_BYTE_BUDGET
          // (_round_up(max(tm, _SUBLANE), _SUBLANE) * itemsize) // _LANE) * _LANE
    tk = max(_LANE, min(tk, f_pad))
    return tm, tk


def _vmem_limit_bytes(tm, tk, itemsize, fsplit):
    x_tile = _round_up(max(tm, _SUBLANE), _SUBLANE) * _round_up(tk, _LANE) * itemsize
    w_tile = _SUBLANE * _round_up(tk, _LANE) * itemsize
    o_tile = _SUBLANE * _round_up(max(tm, _LANE), _LANE) * 4
    acc = o_tile if fsplit else 0
    limit = 2 * (x_tile + w_tile + o_tile) + acc + (2 << 20)   # slack
    return int(min(max(limit, 16 << 20), 48 << 20))            # <= ~48 MiB (v7x-safe)


def _logreg_kernel(x_ref, w_ref, b_ref, o_ref):
    # x_ref: (TM, F) VMEM | w_ref: (1, F) VMEM | b_ref: (1, 1) SMEM | o_ref: (1, TM)
    x = x_ref[...].astype(jnp.float32)
    w = w_ref[...].astype(jnp.float32)
    logits = jnp.sum(x * w, axis=-1, keepdims=True)          # (TM, 1): VPU mul + XLU reduce
    # Relayout to lane-dense (1, TM) first, so bias add / EUP exp / divide run on
    # dense vregs (not 1-of-128-lane ones) and the store is an unmasked vst.
    z = logits.T + b_ref[0, 0]                               # (1, TM)
    o_ref[...] = (1.0 / (1.0 + jnp.exp(-z))).astype(o_ref.dtype)


def _make_fsplit_kernel(f, tk):
    needs_mask = (f % tk) != 0

    def kernel(x_ref, w_ref, b_ref, o_ref, acc_ref):
        # x_ref: (TM, TK) | w_ref: (1, TK) | b_ref: (1, 1) SMEM
        # o_ref: (1, TM)  | acc_ref: (1, TM) f32 VMEM scratch
        kk = pl.program_id(1)

        @pl.when(kk == 0)
        def _():
            acc_ref[...] = jnp.zeros_like(acc_ref)

        x = x_ref[...].astype(jnp.float32)
        w = w_ref[...].astype(jnp.float32)
        prod = x * w
        if needs_mask:
            # Zero out-of-range feature columns of the (partial) last F tile.
            col = lax.broadcasted_iota(jnp.int32, prod.shape, 1) + kk * tk
            prod = jnp.where(col < f, prod, 0.0)
        acc_ref[...] += jnp.sum(prod, axis=-1, keepdims=True).T   # (1, TM)

        @pl.when(kk == pl.num_programs(1) - 1)
        def _():
            z = acc_ref[...] + b_ref[0, 0]
            o_ref[...] = (1.0 / (1.0 + jnp.exp(-z))).astype(o_ref.dtype)

    return kernel


@functools.partial(jax.jit, static_argnames=("block_m", "block_k"))
def logistic_regression(x, weight, bias, *, block_m=None, block_k=None):
    """x: [N, F], weight: [1, F] (nn.Linear layout), bias: [1] -> sigmoid(x @ W.T + b): [N, 1]."""
    n, f = x.shape
    itemsize = jnp.dtype(x.dtype).itemsize
    tm_auto, tk_auto = _pick_tiles(n, f, itemsize)
    tm = tm_auto if block_m is None else min(block_m, n)
    tk = tk_auto if block_k is None else block_k
    b2d = bias.reshape(1, 1).astype(jnp.float32)

    fsplit = (tk is not None) and (tk < f)
    if not fsplit:
        out = pl.pallas_call(
            _logreg_kernel,
            out_shape=jax.ShapeDtypeStruct((1, n), x.dtype),
            grid_spec=pltpu.PrefetchScalarGridSpec(
                num_scalar_prefetch=0,
                grid=(pl.cdiv(n, tm),),
                in_specs=[
                    pl.BlockSpec((tm, f), lambda i: (i, 0)),                   # x tile
                    pl.BlockSpec((1, f), lambda i: (0, 0)),                    # weight row
                    pl.BlockSpec((1, 1), lambda i: (0, 0),
                                 memory_space=pltpu.SMEM),                     # bias scalar
                ],
                out_specs=pl.BlockSpec((1, tm), lambda i: (0, i)),             # lane-dense
            ),
            compiler_params=pltpu.CompilerParams(
                dimension_semantics=("parallel",),
                vmem_limit_bytes=_vmem_limit_bytes(tm, f, itemsize, fsplit=False),
            ),
        )(x, weight, b2d)
    else:
        out = pl.pallas_call(
            _make_fsplit_kernel(f, tk),
            out_shape=jax.ShapeDtypeStruct((1, n), x.dtype),
            grid_spec=pltpu.PrefetchScalarGridSpec(
                num_scalar_prefetch=0,
                grid=(pl.cdiv(n, tm), pl.cdiv(f, tk)),                         # reduction last
                in_specs=[
                    pl.BlockSpec((tm, tk), lambda i, k: (i, k)),               # x tile
                    pl.BlockSpec((1, tk), lambda i, k: (0, k)),                # weight slice
                    pl.BlockSpec((1, 1), lambda i, k: (0, 0),
                                 memory_space=pltpu.SMEM),                     # bias scalar
                ],
                out_specs=pl.BlockSpec((1, tm), lambda i, k: (0, i)),          # lane-dense
                scratch_shapes=[pltpu.VMEM((1, tm), jnp.float32)],             # accumulator
            ),
            compiler_params=pltpu.CompilerParams(
                dimension_semantics=("parallel", "arbitrary"),
                vmem_limit_bytes=_vmem_limit_bytes(tm, tk, itemsize, fsplit=True),
            ),
        )(x, weight, b2d)
    return out.reshape(n, 1)


def _reference(x, weight, bias):
    return jax.nn.sigmoid(x @ weight.T + bias)


if __name__ == "__main__":
    key = jax.random.PRNGKey(0)
    kx, kw, kb = jax.random.split(key, 3)

    N, F = 8, 32  # batch=8, n_input_features=32
    x = jax.random.normal(kx, (N, F), dtype=jnp.float32)
    bound = 1.0 / (F ** 0.5)
    weight = jax.random.uniform(kw, (1, F), jnp.float32, -bound, bound)
    bias = jax.random.uniform(kb, (1,), jnp.float32, -bound, bound)

    y = jax.block_until_ready(logistic_regression(x, weight, bias))
    y_ref = _reference(x, weight, bias)
    assert y.shape == (N, 1)
    assert jnp.allclose(y, y_ref, atol=1e-5, rtol=1e-5)

    # Tiled batch path: multiple grid steps + partial last tile.
    N2 = 320
    x2 = jax.random.normal(jax.random.PRNGKey(1), (N2, F), dtype=jnp.float32)
    y2 = jax.block_until_ready(logistic_regression(x2, weight, bias, block_m=128))
    y2_ref = _reference(x2, weight, bias)
    assert y2.shape == (N2, 1)
    assert jnp.allclose(y2, y2_ref, atol=1e-5, rtol=1e-5)

    # F-split (reduction-axis) path with a partial, masked last feature tile.
    N3, F3 = 256, 200
    kx3, kw3, kb3 = jax.random.split(jax.random.PRNGKey(2), 3)
    x3 = jax.random.normal(kx3, (N3, F3), dtype=jnp.float32)
    b3 = 1.0 / (F3 ** 0.5)
    w3 = jax.random.uniform(kw3, (1, F3), jnp.float32, -b3, b3)
    bias3 = jax.random.uniform(kb3, (1,), jnp.float32, -b3, b3)
    y3 = jax.block_until_ready(
        logistic_regression(x3, w3, bias3, block_m=128, block_k=128))
    y3_ref = _reference(x3, w3, bias3)
    assert y3.shape == (N3, 1)
    assert jnp.allclose(y3, y3_ref, atol=1e-5, rtol=1e-5)

    print("KERNEL_OK")
</pallas_src>

<mosaic_0001>
module attributes {stable_mosaic.version = 11 : i64} {
  func.func @_logreg_kernel(%arg0: i32, %arg1: memref<8x32xf32, #tpu.memory_space<vmem>>, %arg2: memref<1x32xf32, #tpu.memory_space<vmem>>, %arg3: memref<1x1xf32, #tpu.memory_space<smem>>, %arg4: memref<1x8xf32, #tpu.memory_space<vmem>>) attributes {dimension_semantics = [#tpu.dimension_semantics<parallel>], iteration_bounds = array<i64: 1>, scalar_prefetch = 0 : i64, scratch_operands = 0 : i64, tpu.core_type = #tpu.core_type<tc>, window_params = [{transform_indices = @transform_0, window_bounds = array<i64: 8, 32>}, {pipeline_mode = #tpu.pipeline_mode<synchronous>, transform_indices = @transform_1, window_bounds = array<i64: 1, 32>}, {transform_indices = @transform_2, window_bounds = array<i64: 1, 1>}, {transform_indices = @transform_3, window_bounds = array<i64: 1, 8>}]} {
    %c0 = arith.constant 0 : index
    %c0_0 = arith.constant 0 : index
    %0 = vector.load %arg1[%c0, %c0_0] : memref<8x32xf32, #tpu.memory_space<vmem>>, vector<8x32xf32>
    %c0_1 = arith.constant 0 : index
    %c0_2 = arith.constant 0 : index
    %1 = vector.load %arg2[%c0_1, %c0_2] : memref<1x32xf32, #tpu.memory_space<vmem>>, vector<1x32xf32>
    %2 = vector.broadcast %1 : vector<1x32xf32> to vector<8x32xf32>
    %3 = arith.mulf %0, %2 : vector<8x32xf32>
    %cst = arith.constant dense<0.000000e+00> : vector<8xf32>
    %4 = vector.multi_reduction <add>, %3, %cst [1] : vector<8x32xf32> to vector<8xf32>
    %5 = vector.shape_cast %4 : vector<8xf32> to vector<8x1xf32>
    %6 = tpu.transpose %5, [1, 0] : vector<8x1xf32> -> vector<1x8xf32>
    %c0_3 = arith.constant 0 : index
    %c0_4 = arith.constant 0 : index
    %7 = memref.load %arg3[%c0_3, %c0_4] : memref<1x1xf32, #tpu.memory_space<smem>>
    %8 = vector.broadcast %7 : f32 to vector<1x8xf32>
    %9 = arith.addf %6, %8 : vector<1x8xf32>
    %cst_5 = arith.constant 0.000000e+00 : f32
    %10 = vector.broadcast %cst_5 : f32 to vector<1x8xf32>
    %11 = arith.subf %10, %9 : vector<1x8xf32>
    %12 = math.exp %11 : vector<1x8xf32>
    %cst_6 = arith.constant 1.000000e+00 : f32
    %13 = vector.broadcast %cst_6 : f32 to vector<1x8xf32>
    %14 = arith.addf %13, %12 : vector<1x8xf32>
    %cst_7 = arith.constant 1.000000e+00 : f32
    %15 = vector.broadcast %cst_7 : f32 to vector<1x8xf32>
    %16 = arith.divf %15, %14 : vector<1x8xf32>
    %c0_8 = arith.constant 0 : index
    %c0_9 = arith.constant 0 : index
    %17 = vector.load %arg4[%c0_8, %c0_9] : memref<1x8xf32, #tpu.memory_space<vmem>>, vector<1x8xf32>
    tpu.vector_store %arg4[%c0_8, %c0_9], %16 {strides = array<i32>} : memref<1x8xf32, #tpu.memory_space<vmem>>, vector<1x8xf32>,
    return
  }
  func.func @transform_0(%arg0: i32) -> (i32, i32) {
    %c0_i32 = arith.constant 0 : i32
    %c0_i32_0 = arith.constant 0 : i32
    return %arg0, %c0_i32 : i32, i32
  }
  func.func @transform_1(%arg0: i32) -> (i32, i32) {
    %c0_i32 = arith.constant 0 : i32
    %c0_i32_0 = arith.constant 0 : i32
    %c0_i32_1 = arith.constant 0 : i32
    return %c0_i32, %c0_i32_0 : i32, i32
  }
  func.func @transform_2(%arg0: i32) -> (i32, i32) {
    %c0_i32 = arith.constant 0 : i32
    %c0_i32_0 = arith.constant 0 : i32
    %c0_i32_1 = arith.constant 0 : i32
    return %c0_i32, %c0_i32_0 : i32, i32
  }
  func.func @transform_3(%arg0: i32) -> (i32, i32) {
    %c0_i32 = arith.constant 0 : i32
    %c0_i32_0 = arith.constant 0 : i32
    return %c0_i32, %arg0 : i32, i32
  }
}

</mosaic_0001>

<bundles_post_ra>
// kernel: logistic_regression.1
= control target key start
LH: loop header
LB: loop body
LE: loop exit
PB: predicated region body
PF: predicated region fallthrough
CT: control target
= control target key end

     0   :  { %9 = vsyncpa [#allocation4], 0  ;;  %s185_s0 = inlined_call_operand.hbm [shape: f32[8,32], index: 0, kind: input, shape index: {}]   ;;  %s186_s1 = inlined_call_operand.vmem [shape: f32[1,32], index: 1, kind: input, shape index: {}]   ;;  %s187_s2 = inlined_call_operand.<no memory space> [shape: f32[1,1], index: 2, kind: input, shape index: {}]   ;;  %s188_s3 = inlined_call_operand.hbm [shape: f32[1,8], index: 3, kind: output, shape index: {}]  }
   0x1   :  { %10 = vsyncpa [#allocation5], 0  ;;  %s151_s12 = smov [#allocation3]  }
   0x2   :  { %s17_s13 = sshll.u32 %s151_s12, 4  ;;  %s18_s13 = int_to_ptr.vmem [resolvable:$true] %s17_s13 }
   0x3   :  { %s115_s14 = scalar_lea.vmem %s18_s13, 128  ;;  %p120_p1 = scmp.lt.s32.totalorder %s18_s13, %s18_s13 }
   0x4   :  { %p116_p0 = scmp.ne.s32.totalorder %s18_s13, %s115_s14  ;;  %p121_p2 = scmp.lt.s32.totalorder %s115_s14, %s115_s14 }
   0x6   :  { %p122_p3 = por %p121_p2, %p120_p1 }
   0x8   :  { %p123_p4 = pnand %p122_p3, %p116_p0 }
   0xa   :  { %126 = shalt.err (!%p123_p4)
}
   0xb   :  { %20 = dma.hbm_to_vmem [thread:$0]  %s185_s0, 128, %s18_s13, [#allocation4]  }
   0xc   :  { %147 = dma.done.wait [#allocation4], 128  }
   0xd   :  { %148 = vsyncadd [#allocation4], 4294967168  ;;  %v28_v0 = vld [vmem:[#allocation3] sm:$0xff]  ;;  %vm37_vm0 = vcmask 261120   ;;  %v74_v5 = vstv %s187_s2  ;;  %s152_s0 = smov [#allocation6]   ;;  %vm82_vm1 = vcmask 57344  }
   0xe   :  { %v99_v1 = vld [vmem:[%s186_s1] ss:$0 sm:$0xff]  ;;  %s90_s1 = sshll.u32 %s152_s0, 4  ;;  %s91_s1 = int_to_ptr.vmem [resolvable:$true] %s90_s1 }
   0xf   :  { %v36_v2 = vmul.f32 %v99_v1, %v28_v0  ;;  %s127_s21 = scalar_lea.vmem %s91_s1, 16  ;;  %s131_s22 = scalar_lea.vmem %s91_s1, 32 }
  0x10   :  { %p128_p5 = scmp.ne.s32.totalorder %s91_s1, %s127_s21  ;;  %p132_p6 = scmp.lt.s32.totalorder %s91_s1, %s91_s1 }
  0x11   :  { %v38_v3 = vsel %vm37_vm0, %v36_v2, 0.0  ;;  %p133_p7 = scmp.lt.s32.totalorder %s131_s22, %s127_s21 }
  0x12   :  { %39 = vadd.xlane.f32.xlu0 %v38_v3 }
  0x13   :  { %p134_p8 = por %p133_p7, %p132_p6 }
  0x15   :  { %p135_p9 = pnand %p134_p8, %p128_p5 }
  0x9b   :  { %v40_v4 = vpop.xlane.xlu0 %39 }
  0x9c   :  { %41 = vxpose.xlu0.b32.start.end [1/1] (short) (narrow) %v40_v4, 8 }
 0x118   :  { %v57_v6 = vpop.trf.xlu0 }
 0x119   :  { %v75_v7 = vadd.f32 %v74_v5, %v57_v6 }
 0x11b   :  { %v76_v8 = vsub.f32 0.0, %v75_v7 }
 0x11d   :  { %v77_v9 = vmul.f32 1.442695, %v76_v8 }
 0x11f   :  { %103 = vpow2.f32 %v77_v9 }
 0x12c   :  { %v104_v10 = vpop.eup %103 }
 0x12d   :  { %v79_v11 = vadd.f32 1.0, %v104_v10 }
 0x12f   :  { %105 = vrcp.f32 %v79_v11 }
 0x13c   :  { %v106_v12 = vpop.eup %105 }
 0x13d   :  { %83 = vst.msk [vmem:[#allocation6] sm:$0x1] %vm82_vm1, %v106_v12 }
 0x13e   :  { %138 = shalt.err (!%p135_p9)
}
 0x13f   :  { %93 = dma.vmem_to_hbm [thread:$0]  %s91_s1, 16, %s188_s3, [#allocation5]  }
 0x140   :  { %149 = dma.done.wait [#allocation5], 16  }
 0x141   :  { %150 = vsyncadd [#allocation5], 4294967280 }
 0x142   :  { %97 = vsyncpa [#allocation4], 1 }
 0x143   :  { %98 = vsyncpa [#allocation5], 1 }

</bundles_post_ra>
